<compile_context>
chip_gen: v6e
topology: v6e:2x2x1
jax: 0.10.0
libtpu: 0.0.40
codegen_flags: <defaults>
</compile_context>

<pallas_src>
import functools

import jax
import jax.numpy as jnp
from jax.experimental import pallas as pl
from jax.experimental.pallas import tpu as pltpu


# ------------------------------ kernel -------------------------------------
def _taylor_kan_kernel(x_ref, *refs, order, num_layers):
    """Fused multi-layer TaylorKAN forward on one batch tile.

    x_ref : (TB, I0)                      activation tile, VMEM
    refs  : (wc_0, b_0, ..., wc_{L-1}, b_{L-1}, o_ref)
        wc_l : (order * I_l, O_l)         fused polynomial weights, VMEM-resident
        b_l  : (1, O_l)                   constant (k=0) term, VMEM-resident
        o_ref: (TB, O_last)               output tile, VMEM
    """
    o_ref = refs[-1]
    layer_refs = refs[:-1]

    x = x_ref[...].astype(jnp.float32)
    for li in range(num_layers):                       # static unroll over layers
        wc = layer_refs[2 * li][...]                   # (order*I, O)
        bias = layer_refs[2 * li + 1][...]             # (1, O)

        t = jnp.tanh(x)                                # EUP; tanh_range folded into wc
        # Build the stacked-power slab P = [t, t^2, ..., t^order]  -> (TB, order*I)
        p = t
        powers = [p]
        for _ in range(order - 1):
            p = p * t
            powers.append(p)
        P = jnp.concatenate(powers, axis=-1)

        # One MXU matmul per layer (K = order*I), plus the precomputed bias.
        x = bias + jnp.dot(P, wc, preferred_element_type=jnp.float32)

    o_ref[...] = x.astype(o_ref.dtype)


# ------------------------------ wrapper ------------------------------------
def taylor_kan_forward(x, fused_params, *, order, block_b=512):
    """Fused forward. x: (B, I0); fused_params: list of dicts (wc_flat, bias)."""
    assert order >= 1, "order must be >= 1"
    B, I0 = x.shape
    num_layers = len(fused_params)
    o_last = fused_params[-1]["bias"].shape[-1]

    # Batch tiling: single tile for tiny batches, otherwise block_b-row tiles.
    tb = B if B <= block_b else block_b
    grid = (pl.cdiv(B, tb),)

    in_specs = [pl.BlockSpec((tb, I0), lambda i: (i, 0))]
    inputs = [x]
    for lp in fused_params:
        wc = lp["wc_flat"]                             # (order*I, O)
        bias = lp["bias"]                              # (1, O)
        ki, o = wc.shape
        # Full-extent blocks with constant index_map -> weights stay resident
        # in VMEM across all batch tiles.
        in_specs.append(pl.BlockSpec((ki, o), lambda i: (0, 0)))
        in_specs.append(pl.BlockSpec((1, o), lambda i: (0, 0)))
        inputs += [wc, bias]

    kernel = functools.partial(_taylor_kan_kernel, order=order,
                               num_layers=num_layers)
    return pl.pallas_call(
        kernel,
        out_shape=jax.ShapeDtypeStruct((B, o_last), jnp.float32),
        grid=grid,
        in_specs=in_specs,
        out_specs=pl.BlockSpec((tb, o_last), lambda i: (i, 0)),
        compiler_params=pltpu.CompilerParams(
            dimension_semantics=("parallel",)),        # v7x: split batch tiles over 2 TCs
    )(*inputs)


# ------------------------- parameter handling -------------------------------
def init_taylor_kan_params(key, layer_sizes, order):
    """Deterministic init mirroring the torch module's parameter shapes."""
    params = []
    for li in range(1, len(layer_sizes)):
        in_size, out_size = layer_sizes[li - 1], layer_sizes[li]
        key, kw, kc = jax.random.split(key, 3)
        weights = jax.random.normal(kw, (out_size, in_size), jnp.float32)
        coeffs = jax.random.normal(
            kc, (out_size, in_size, order + 1), jnp.float32) * 0.1
        tanh_range = jnp.float32(1.0)
        params.append(dict(weights=weights, coeffs=coeffs,
                           tanh_range=tanh_range))
    return params


def fuse_layer_params(layer_p, *, order):
    """Fold weights, coefficients and tanh_range into (wc_flat, bias).

    fused[o, i, k] = weights[o, i] * coeffs[o, i, k] * tanh_range**k
    bias[o]        = sum_i fused[o, i, 0]
    wc_flat[(k-1)*I + i, o] = fused[o, i, k]   for k = 1..order
    """
    w = layer_p["weights"]                                  # (O, I)
    c = layer_p["coeffs"]                                   # (O, I, order+1)
    tr = layer_p["tanh_range"]
    ks = jnp.arange(order + 1, dtype=jnp.float32)
    fused = c * w[:, :, None] * (tr ** ks)[None, None, :]   # (O, I, order+1)
    bias = jnp.sum(fused[:, :, 0], axis=1)[None, :]         # (1, O)
    out_size, in_size = w.shape
    wc_flat = jnp.transpose(fused[:, :, 1:], (2, 1, 0))     # (order, I, O)
    wc_flat = wc_flat.reshape(order * in_size, out_size)    # (order*I, O)
    return dict(wc_flat=wc_flat, bias=bias)


def fuse_params(params, *, order):
    # Hoisted: call once per parameter update, NOT inside the forward pass.
    return [fuse_layer_params(p, order=order) for p in params]


# ---- pure-JAX reference (mirrors the torch forward, incl. Horner eval) ----
def _reference_layer(x, layer_p, order):
    t = jnp.tanh(x) * layer_p["tanh_range"]                  # (B, I)
    coeffs = layer_p["coeffs"]                               # (O, I, P+1)
    val = jnp.broadcast_to(coeffs[:, :, order][None, :, :],
                           (t.shape[0],) + coeffs.shape[:2])  # (B, O, I)
    for k in range(order - 1, -1, -1):
        val = val * t[:, None, :] + coeffs[None, :, :, k]
    return jnp.einsum("boi,oi->bo", val, layer_p["weights"])


def reference_forward(x, params, order):
    for layer_p in params:
        x = _reference_layer(x, layer_p, order)
    return x


if __name__ == "__main__":
    key = jax.random.PRNGKey(0)
    order = 5
    layer_sizes = [32, 64, 16]
    batch = 8

    kx, kp = jax.random.split(key)
    x = jax.random.normal(kx, (batch, layer_sizes[0]), jnp.float32)
    params = init_taylor_kan_params(kp, layer_sizes, order)

    # Fuse once (outside the forward path).
    fused = fuse_params(params, order=order)

    fwd = jax.jit(functools.partial(taylor_kan_forward, order=order))
    out = jax.block_until_ready(fwd(x, fused))
    ref = jax.block_until_ready(reference_forward(x, params, order))

    assert out.shape == (batch, layer_sizes[-1])
    assert jnp.allclose(out, ref, atol=1e-3, rtol=1e-3), (
        f"max abs err {jnp.max(jnp.abs(out - ref))}")
    print("KERNEL_OK")
</pallas_src>

<mosaic_0001>
module attributes {stable_mosaic.version = 11 : i64} {
  func.func @_taylor_kan_kernel(%arg0: i32, %arg1: memref<8x32xf32, #tpu.memory_space<vmem>>, %arg2: memref<160x64xf32, #tpu.memory_space<vmem>>, %arg3: memref<1x64xf32, #tpu.memory_space<vmem>>, %arg4: memref<320x16xf32, #tpu.memory_space<vmem>>, %arg5: memref<1x16xf32, #tpu.memory_space<vmem>>, %arg6: memref<8x16xf32, #tpu.memory_space<vmem>>) attributes {dimension_semantics = [#tpu.dimension_semantics<parallel>], iteration_bounds = array<i64: 1>, scalar_prefetch = 0 : i64, scratch_operands = 0 : i64, tpu.core_type = #tpu.core_type<tc>, window_params = [{transform_indices = @transform_0, window_bounds = array<i64: 8, 32>}, {pipeline_mode = #tpu.pipeline_mode<synchronous>, transform_indices = @transform_1, window_bounds = array<i64: 160, 64>}, {pipeline_mode = #tpu.pipeline_mode<synchronous>, transform_indices = @transform_2, window_bounds = array<i64: 1, 64>}, {pipeline_mode = #tpu.pipeline_mode<synchronous>, transform_indices = @transform_3, window_bounds = array<i64: 320, 16>}, {pipeline_mode = #tpu.pipeline_mode<synchronous>, transform_indices = @transform_4, window_bounds = array<i64: 1, 16>}, {transform_indices = @transform_5, window_bounds = array<i64: 8, 16>}]} {
    %c0 = arith.constant 0 : index
    %c0_0 = arith.constant 0 : index
    %0 = vector.load %arg1[%c0, %c0_0] : memref<8x32xf32, #tpu.memory_space<vmem>>, vector<8x32xf32>
    %c0_1 = arith.constant 0 : index
    %c0_2 = arith.constant 0 : index
    %1 = vector.load %arg2[%c0_1, %c0_2] : memref<160x64xf32, #tpu.memory_space<vmem>>, vector<160x64xf32>
    %c0_3 = arith.constant 0 : index
    %c0_4 = arith.constant 0 : index
    %2 = vector.load %arg3[%c0_3, %c0_4] : memref<1x64xf32, #tpu.memory_space<vmem>>, vector<1x64xf32>
    %3 = math.tanh %0 : vector<8x32xf32>
    %4 = arith.mulf %3, %3 : vector<8x32xf32>
    %5 = arith.mulf %4, %3 : vector<8x32xf32>
    %6 = arith.mulf %5, %3 : vector<8x32xf32>
    %7 = arith.mulf %6, %3 : vector<8x32xf32>
    %8 = tpu.concatenate %3, %4, %5, %6, %7 in 1 : vector<8x32xf32>, vector<8x32xf32>, vector<8x32xf32>, vector<8x32xf32>, vector<8x32xf32> -> vector<8x160xf32>
    %cst = arith.constant dense<0.000000e+00> : vector<8x64xf32>
    %9 = tpu.matmul %8, %1, %cst {dimension_numbers = #tpu.dot_dimension_numbers<[1], [0], [0], [1], [0, 0, 1, 1], [], []>} : vector<8x160xf32>, vector<160x64xf32>, vector<8x64xf32> -> vector<8x64xf32>
    %10 = vector.broadcast %2 : vector<1x64xf32> to vector<8x64xf32>
    %11 = arith.addf %10, %9 : vector<8x64xf32>
    %c0_5 = arith.constant 0 : index
    %c0_6 = arith.constant 0 : index
    %12 = vector.load %arg4[%c0_5, %c0_6] : memref<320x16xf32, #tpu.memory_space<vmem>>, vector<320x16xf32>
    %c0_7 = arith.constant 0 : index
    %c0_8 = arith.constant 0 : index
    %13 = vector.load %arg5[%c0_7, %c0_8] : memref<1x16xf32, #tpu.memory_space<vmem>>, vector<1x16xf32>
    %14 = math.tanh %11 : vector<8x64xf32>
    %15 = arith.mulf %14, %14 : vector<8x64xf32>
    %16 = arith.mulf %15, %14 : vector<8x64xf32>
    %17 = arith.mulf %16, %14 : vector<8x64xf32>
    %18 = arith.mulf %17, %14 : vector<8x64xf32>
    %19 = tpu.concatenate %14, %15, %16, %17, %18 in 1 : vector<8x64xf32>, vector<8x64xf32>, vector<8x64xf32>, vector<8x64xf32>, vector<8x64xf32> -> vector<8x320xf32>
    %cst_9 = arith.constant dense<0.000000e+00> : vector<8x16xf32>
    %20 = tpu.matmul %19, %12, %cst_9 {dimension_numbers = #tpu.dot_dimension_numbers<[1], [0], [0], [1], [0, 0, 1, 1], [], []>} : vector<8x320xf32>, vector<320x16xf32>, vector<8x16xf32> -> vector<8x16xf32>
    %21 = vector.broadcast %13 : vector<1x16xf32> to vector<8x16xf32>
    %22 = arith.addf %21, %20 : vector<8x16xf32>
    %c0_10 = arith.constant 0 : index
    %c0_11 = arith.constant 0 : index
    %23 = vector.load %arg6[%c0_10, %c0_11] : memref<8x16xf32, #tpu.memory_space<vmem>>, vector<8x16xf32>
    tpu.vector_store %arg6[%c0_10, %c0_11], %22 {strides = array<i32>} : memref<8x16xf32, #tpu.memory_space<vmem>>, vector<8x16xf32>,
    return
  }
  func.func @transform_0(%arg0: i32) -> (i32, i32) {
    %c0_i32 = arith.constant 0 : i32
    %c0_i32_0 = arith.constant 0 : i32
    return %arg0, %c0_i32 : i32, i32
  }
  func.func @transform_1(%arg0: i32) -> (i32, i32) {
    %c0_i32 = arith.constant 0 : i32
    %c0_i32_0 = arith.constant 0 : i32
    %c0_i32_1 = arith.constant 0 : i32
    return %c0_i32, %c0_i32_0 : i32, i32
  }
  func.func @transform_2(%arg0: i32) -> (i32, i32) {
    %c0_i32 = arith.constant 0 : i32
    %c0_i32_0 = arith.constant 0 : i32
    %c0_i32_1 = arith.constant 0 : i32
    return %c0_i32, %c0_i32_0 : i32, i32
  }
  func.func @transform_3(%arg0: i32) -> (i32, i32) {
    %c0_i32 = arith.constant 0 : i32
    %c0_i32_0 = arith.constant 0 : i32
    %c0_i32_1 = arith.constant 0 : i32
    return %c0_i32, %c0_i32_0 : i32, i32
  }
  func.func @transform_4(%arg0: i32) -> (i32, i32) {
    %c0_i32 = arith.constant 0 : i32
    %c0_i32_0 = arith.constant 0 : i32
    %c0_i32_1 = arith.constant 0 : i32
    return %c0_i32, %c0_i32_0 : i32, i32
  }
  func.func @transform_5(%arg0: i32) -> (i32, i32) {
    %c0_i32 = arith.constant 0 : i32
    %c0_i32_0 = arith.constant 0 : i32
    return %arg0, %c0_i32 : i32, i32
  }
}

</mosaic_0001>

<bundles_post_ra>
// kernel: taylor_kan_forward.1
= control target key start
LH: loop header
LB: loop body
LE: loop exit
PB: predicated region body
PF: predicated region fallthrough
CT: control target
= control target key end

     0   :  { %v472_v2 = vmov 0.0   ;;  %s737_s0 = inlined_call_operand.vmem [shape: f32[8,32], index: 0, kind: input, shape index: {}]   ;;  %s738_s1 = inlined_call_operand.vmem [shape: f32[160,64], index: 1, kind: input, shape index: {}]   ;;  %s739_s2 = inlined_call_operand.vmem [shape: f32[1,64], index: 2, kind: input, shape index: {}]   ;;  %s740_s3 = inlined_call_operand.vmem [shape: f32[320,16], index: 3, kind: input, shape index: {}]   ;;  %s741_s4 = inlined_call_operand.vmem [shape: f32[1,16], index: 4, kind: input, shape index: {}]   ;;  %s742_s5 = inlined_call_operand.hbm [shape: f32[8,16], index: 5, kind: output, shape index: {}]  }
   0x1   :  { %v21_v0 = vld [vmem:[%s737_s0] sm:$0xff]  ;;  %v37_v1 = vld [vmem:[%s738_s1 + $0x78] sm:$0xff]  ;;  %69 = vmatprep.subr.mxu0 %v472_v2  ;;  %v36_v3 = vld [vmem:[%s738_s1 + $0x70] sm:$0xff] }
   0x2   :  { %446 = vtanh.f32 %v21_v0  ;;  %70 = vmatpush1.msra.mxu0 %v37_v1  ;;  %v35_v4 = vld [vmem:[%s738_s1 + $0x68] sm:$0xff]  ;;  %v34_v5 = vld [vmem:[%s738_s1 + $0x60] sm:$0xff] }
   0x3   :  { %71 = vmatprep.subr.mxu0 %v472_v2 }
   0x4   :  { %72 = vmatpush1.msra.mxu0 %v36_v3 }
   0x5   :  { %73 = vmatprep.subr.mxu0 %v472_v2 }
   0x6   :  { %74 = vmatpush1.msra.mxu0 %v35_v4 }
   0x7   :  { %10 = vsyncpa [#allocation3], 0  ;;  %75 = vmatprep.subr.mxu0 %v472_v2  ;;  %v33_v6 = vld [vmem:[%s738_s1 + $0x58] sm:$0xff]  ;;  %v32_v7 = vld [vmem:[%s738_s1 + $0x50] sm:$0xff]  ;;  %s473_s12 = smov 32   ;;  %s474_s17 = smov 64  }
   0x8   :  { %76 = vmatpush1.msra.mxu0 %v34_v5  ;;  %v31_v8 = vld [vmem:[%s738_s1 + $0x48] sm:$0xff]  ;;  %v30_v9 = vld [vmem:[%s738_s1 + $0x40] sm:$0xff]  ;;  %v29_v12 = vld [vmem:[%s738_s1 + $0x38] sm:$0xff]  ;;  %s475_s18 = smov 96   ;;  %vm60_vm0 = vcmask 261120   ;;  %vm62_vm1 = vcmask 523264  }
   0x9   :  { %77 = vmatprep.subr.mxu0 %v472_v2  ;;  %v28_v14 = vld [vmem:[%s738_s1 + $0x30] sm:$0xff]  ;;  %v27_v16 = vld [vmem:[%s738_s1 + $0x28] sm:$0xff]  ;;  %v26_v18 = vld [vmem:[%s738_s1 + $0x20] sm:$0xff]  ;;  %vm64_vm2 = vcmask 785408   ;;  %vm476_vm3 = vmmov 0   ;;  %s477_s14 = smov [#allocation2]  }
   0xa   :  { %78 = vmatpush1.msra.mxu0 %v33_v6  ;;  %v25_v19 = vld [vmem:[%s738_s1 + $0x18] sm:$0xff]  ;;  %v24_v20 = vld [vmem:[%s738_s1 + $0x10] sm:$0xff]  ;;  %v23_v21 = vld [vmem:[%s738_s1 + $0x8] sm:$0xff]  ;;  %s360_s15 = sshll.u32 %s477_s14, 4  ;;  %vm352_vm4 = vcmask 130048   ;;  %s361_s15 = int_to_ptr.vmem [resolvable:$true] %s360_s15 }
   0xb   :  { %79 = vmatprep.subr.mxu0 %v472_v2  ;;  %v22_v22 = vld [vmem:[%s738_s1] sm:$0xff]  ;;  %v41_v23 = vld [vmem:[%s738_s1 + $0x98] sm:$0xff]  ;;  %v40_v24 = vld [vmem:[%s738_s1 + $0x90] sm:$0xff]  ;;  %p455_p1 = scmp.lt.s32.totalorder %s361_s15, %s361_s15 }
   0xc   :  { %80 = vmatpush1.msra.mxu0 %v32_v7  ;;  %v39_v25 = vld [vmem:[%s738_s1 + $0x88] sm:$0xff]  ;;  %v38_v26 = vld [vmem:[%s738_s1 + $0x80] sm:$0xff]  ;;  %v177_v33 = vld [vmem:[%s740_s3 + $0xf8] sm:$0xff] }
   0xd   :  { %81 = vmatprep.subr.mxu0 %v472_v2  ;;  %v161_v34 = vld [vmem:[%s740_s3 + $0x78] sm:$0xff]  ;;  %v176_v35 = vld [vmem:[%s740_s3 + $0xf0] sm:$0xff]  ;;  %372 = vmatprep.subr.mxu1 %v177_v33  ;;  %v175_v37 = vld [vmem:[%s740_s3 + $0xe8] sm:$0xff] }
   0xe   :  { %82 = vmatpush1.msra.mxu0 %v31_v8  ;;  %v160_v36 = vld [vmem:[%s740_s3 + $0x70] sm:$0xff]  ;;  %373 = vmatpush3.msra.mxu1 %v161_v34  ;;  %v159_v38 = vld [vmem:[%s740_s3 + $0x68] sm:$0xff]  ;;  %v174_v39 = vld [vmem:[%s740_s3 + $0xe0] sm:$0xff] }
   0xf   :  { %v447_v10 = vpop.eup %446  ;;  %83 = vmatprep.subr.mxu0 %v472_v2  ;;  %374 = vmatprep.subr.mxu1 %v176_v35  ;;  %v158_v40 = vld [vmem:[%s740_s3 + $0x60] sm:$0xff]  ;;  %v173_v41 = vld [vmem:[%s740_s3 + $0xd8] sm:$0xff]  ;;  %v172_v43 = vld [vmem:[%s740_s3 + $0xd0] sm:$0xff] }
  0x10   :  { %v44_v11 = vmul.f32 %v447_v10, %v447_v10  ;;  %84 = vmatpush1.msra.mxu0 %v30_v9  ;;  %375 = vmatpush3.msra.mxu1 %v160_v36  ;;  %v157_v42 = vld [vmem:[%s740_s3 + $0x58] sm:$0xff]  ;;  %v156_v44 = vld [vmem:[%s740_s3 + $0x50] sm:$0xff]  ;;  %v171_v45 = vld [vmem:[%s740_s3 + $0xc8] sm:$0xff] }
  0x11   :  { %85 = vmatprep.subr.mxu0 %v472_v2  ;;  %376 = vmatprep.subr.mxu1 %v175_v37  ;;  %v155_v46 = vld [vmem:[%s740_s3 + $0x48] sm:$0xff]  ;;  %v170_v47 = vld [vmem:[%s740_s3 + $0xc0] sm:$0xff]  ;;  %v169_v49 = vld [vmem:[%s740_s3 + $0xb8] sm:$0xff] }
  0x12   :  { %49 = vrot.lane.b32.xlu0 %v44_v11, %s473_s12  ;;  %v45_v13 = vmul.f32 %v447_v10, %v44_v11  ;;  %86 = vmatpush1.msra.mxu0 %v29_v12  ;;  %v154_v48 = vld [vmem:[%s740_s3 + $0x40] sm:$0xff]  ;;  %v153_v50 = vld [vmem:[%s740_s3 + $0x38] sm:$0xff]  ;;  %v168_v51 = vld [vmem:[%s740_s3 + $0xb0] sm:$0xff] }
  0x13   :  { %87 = vmatprep.subr.mxu0 %v472_v2  ;;  %377 = vmatpush3.msra.mxu1 %v159_v38  ;;  %v152_v52 = vld [vmem:[%s740_s3 + $0x30] sm:$0xff]  ;;  %v167_v53 = vld [vmem:[%s740_s3 + $0xa8] sm:$0xff]  ;;  %v166_v55 = vld [vmem:[%s740_s3 + $0xa0] sm:$0xff] }
  0x14   :  { %v46_v15 = vmul.f32 %v447_v10, %v45_v13  ;;  %88 = vmatpush1.msra.mxu0 %v28_v14  ;;  %378 = vmatprep.subr.mxu1 %v174_v39  ;;  %v151_v54 = vld [vmem:[%s740_s3 + $0x28] sm:$0xff]  ;;  %v150_v56 = vld [vmem:[%s740_s3 + $0x20] sm:$0xff]  ;;  %v165_v57 = vld [vmem:[%s740_s3 + $0x98] sm:$0xff] }
  0x15   :  { %89 = vmatprep.subr.mxu0 %v472_v2  ;;  %379 = vmatpush3.msra.mxu1 %v158_v40  ;;  %v149_v58 = vld [vmem:[%s740_s3 + $0x18] sm:$0xff]  ;;  %v164_v59 = vld [vmem:[%s740_s3 + $0x90] sm:$0xff]  ;;  %v163_v61 = vld [vmem:[%s740_s3 + $0x88] sm:$0xff] }
  0x16   :  { %53 = vrot.lane.b32.xlu0 %v45_v13, %s474_s17  ;;  %57 = vrot.lane.b32.xlu1 %v46_v15, %s475_s18  ;;  %v47_v17 = vmul.f32 %v447_v10, %v46_v15  ;;  %v148_v60 = vld [vmem:[%s740_s3 + $0x10] sm:$0xff]  ;;  %v369_v62 = vld [vmem:[%s739_s2] ss:$0 sm:$0xff] }
  0x17   :  { %90 = vmatpush1.msra.mxu0 %v27_v16  ;;  %380 = vmatprep.subr.mxu1 %v173_v41  ;;  %v147_v3 = vld [vmem:[%s740_s3 + $0x8] sm:$0xff]  ;;  %v162_v4 = vld [vmem:[%s740_s3 + $0x80] sm:$0xff]  ;;  %v185_v16 = vld [vmem:[%s740_s3 + $0x138] sm:$0xff] }
  0x18   :  { %368 = vmatprep.mubr.msk.f32.mxu0 %vm60_vm0, %v47_v17  ;;  %91 = vmatprep.subr.mxu0 %v472_v2  ;;  %v146_v5 = vld [vmem:[%s740_s3] sm:$0xff]  ;;  %v184_v17 = vld [vmem:[%s740_s3 + $0x130] sm:$0xff] }
  0x19   :  { %92 = vmatpush1.msra.mxu0 %v26_v18  ;;  %381 = vmatpush3.msra.mxu1 %v157_v42  ;;  %v183_v18 = vld [vmem:[%s740_s3 + $0x128] sm:$0xff] }
  0x1a   :  { %93 = vmatprep.subr.mxu0 %v472_v2  ;;  %382 = vmatprep.subr.mxu1 %v172_v43 }
  0x1b   :  { %94 = vmatpush1.msra.mxu0 %v25_v19  ;;  %383 = vmatpush3.msra.mxu1 %v156_v44  ;;  %v182_v19 = vld [vmem:[%s740_s3 + $0x120] sm:$0xff] }
  0x1c   :  { %95 = vmatprep.subr.mxu0 %v472_v2  ;;  %384 = vmatprep.subr.mxu1 %v171_v45 }
  0x1d   :  { %96 = vmatpush1.msra.mxu0 %v24_v20  ;;  %385 = vmatpush3.msra.mxu1 %v155_v46  ;;  %v181_v20 = vld [vmem:[%s740_s3 + $0x118] sm:$0xff] }
  0x1e   :  { %97 = vmatprep.subr.mxu0 %v472_v2  ;;  %386 = vmatprep.subr.mxu1 %v170_v47 }
  0x1f   :  { %98 = vmatpush1.msra.mxu0 %v23_v21  ;;  %387 = vmatpush3.msra.mxu1 %v154_v48  ;;  %v180_v21 = vld [vmem:[%s740_s3 + $0x110] sm:$0xff] }
  0x20   :  { %99 = vmatprep.subr.mxu0 %v472_v2  ;;  %388 = vmatprep.subr.mxu1 %v169_v49 }
  0x21   :  { %100 = vmatpush1.msra.mxu0 %v22_v22  ;;  %389 = vmatpush3.msra.mxu1 %v153_v50  ;;  %v179_v22 = vld [vmem:[%s740_s3 + $0x108] sm:$0xff] }
  0x22   :  { %125 = vmatprep.subr.mxu0 %v472_v2  ;;  %390 = vmatprep.subr.mxu1 %v168_v51 }
  0x23   :  { %126 = vmatpush2.msra.mxu0 %v41_v23  ;;  %391 = vmatpush3.msra.mxu1 %v152_v52  ;;  %v178_v23 = vld [vmem:[%s740_s3 + $0x100] sm:$0xff]  ;;  %s450_s3 = scalar_lea.vmem %s361_s15, 128 }
  0x24   :  { %127 = vmatprep.subr.mxu0 %v472_v2  ;;  %392 = vmatprep.subr.mxu1 %v167_v53  ;;  %p451_p0 = scmp.ne.s32.totalorder %s361_s15, %s450_s3  ;;  %p456_p2 = scmp.lt.s32.totalorder %s450_s3, %s450_s3 }
  0x25   :  { %128 = vmatpush2.msra.mxu0 %v40_v24  ;;  %393 = vmatpush3.msra.mxu1 %v151_v54 }
  0x26   :  { %129 = vmatprep.subr.mxu0 %v472_v2  ;;  %394 = vmatprep.subr.mxu1 %v166_v55  ;;  %p457_p3 = por %p456_p2, %p455_p1 }
  0x27   :  { %130 = vmatpush2.msra.mxu0 %v39_v25  ;;  %395 = vmatpush3.msra.mxu1 %v150_v56 }
  0x28   :  { %131 = vmatprep.subr.mxu0 %v472_v2  ;;  %396 = vmatprep.subr.mxu1 %v165_v57  ;;  %p458_p4 = pnand %p457_p3, %p451_p0 }
  0x29   :  { %132 = vmatpush2.msra.mxu0 %v38_v26  ;;  %397 = vmatpush3.msra.mxu1 %v149_v58 }
  0x2a   :  { %398 = vmatprep.subr.mxu1 %v164_v59 }
  0x2b   :  { %399 = vmatpush3.msra.mxu1 %v148_v60 }
  0x2c   :  { %400 = vmatprep.subr.mxu1 %v163_v61 }
  0x2d   :  { %401 = vmatpush3.msra.mxu1 %v147_v3 }
  0x2e   :  { %402 = vmatprep.subr.mxu1 %v162_v4 }
  0x2f   :  { %403 = vmatpush3.msra.mxu1 %v146_v5 }
  0x30   :  { %416 = vmatprep.subr.mxu1 %v472_v2 }
  0x84   :  { %v50_v27 = vpop.permute.xlu0 %49 }
  0x85   :  { %v61_v30 = vsel %vm60_vm0, %v447_v10, %v50_v27 }
  0x88   :  { %v54_v28 = vpop.permute.xlu0 %53  ;;  %v58_v29 = vpop.permute.xlu1 %57 }
  0x89   :  { %v63_v31 = vsel %vm62_vm1, %v61_v30, %v54_v28  ;;  %v371_v28 = vld [vmem:[%s741_s4] ss:$0 sm:$0xff] }
  0x8a   :  { %v65_v32 = vsel %vm64_vm2, %v63_v31, %v58_v29 }
  0x8b   :  { %134 = vmatmul.mubr.f32.vlgmr.msra.gmra.mxu0 %v65_v32 }
 0x14b   :  { %v135_v63 = vpop.f32.mrf.mxu0 }
 0x14c   :  { %v145_v0 = vadd.f32 %v369_v62, %v135_v63 }
 0x14d   :  { %v137_v1 = vpop.f32.mrf.mxu0 }
 0x14e   :  { %448 = vtanh.f32 %v145_v0 }
 0x15b   :  { %v449_v6 = vpop.eup %448 }
 0x15c   :  { %v188_v7 = vmul.f32 %v449_v6, %v449_v6 }
 0x15e   :  { %v189_v8 = vmul.f32 %v449_v6, %v188_v7 }
 0x160   :  { %v190_v9 = vmul.f32 %v449_v6, %v189_v8 }
 0x162   :  { %v441_v10 = vpack.i.bf16 %v188_v7, %v190_v9  ;;  %v191_v24 = vmul.f32 %v449_v6, %v190_v9 }
 0x164   :  { %442 = vrot.lane.b32.xlu1 %v441_v10, %s474_s17 }
 0x1d6   :  { %v443_v11 = vpop.permute.xlu1 %442 }
 0x1d7   :  { %v445_v12 = vunpack.i.h.bf16 %v443_v11  ;;  %v444_v13 = vunpack.i.l.bf16 %v443_v11 }
 0x1d9   :  { %v201_v14 = vsel %vm62_vm1, %v189_v8, %v444_v13  ;;  %v200_v15 = vsel %vm62_vm1, %v449_v6, %v445_v12 }
 0x1da   :  { %269 = vmatprep.mubr.f32.mxu1 %v201_v14 }
 0x1db   :  { %270 = vmatmul.mubr.f32.vlgmr.msra.gmra.mxu1 %v200_v15 }
 0x1dc   :  { %417 = vmatpush3.msra.mxu1 %v185_v16  ;;  %432 = vmatprep.mubr.msk.f32.mxu1 %vm476_vm3, %v472_v2 }
 0x1dd   :  { %418 = vmatprep.subr.mxu1 %v472_v2 }
 0x1de   :  { %419 = vmatpush3.msra.mxu1 %v184_v17 }
 0x1df   :  { %420 = vmatprep.subr.mxu1 %v472_v2 }
 0x1e0   :  { %421 = vmatpush3.msra.mxu1 %v183_v18 }
 0x1e1   :  { %422 = vmatprep.subr.mxu1 %v472_v2 }
 0x1e2   :  { %423 = vmatpush3.msra.mxu1 %v182_v19 }
 0x1e3   :  { %424 = vmatprep.subr.mxu1 %v472_v2 }
 0x1e4   :  { %425 = vmatpush3.msra.mxu1 %v181_v20 }
 0x1e5   :  { %426 = vmatprep.subr.mxu1 %v472_v2 }
 0x1e6   :  { %427 = vmatpush3.msra.mxu1 %v180_v21 }
 0x1e7   :  { %428 = vmatprep.subr.mxu1 %v472_v2 }
 0x1e8   :  { %429 = vmatpush3.msra.mxu1 %v179_v22 }
 0x1e9   :  { %430 = vmatprep.subr.mxu1 %v472_v2 }
 0x1ea   :  { %431 = vmatpush3.msra.mxu1 %v178_v23 }
 0x1eb   :  { %433 = vmatmul.mubr.msk.f32.vlgmr.msra.gmra.mxu1 %vm62_vm1, %v191_v24 }
 0x29b   :  { %v404_v25 = vpop.f32.mrf.mxu1 }
 0x29d   :  { %v405_v26 = vpop.f32.mrf.mxu1 }
 0x29e   :  { %v406_v27 = vadd.f32 %v405_v26, %v404_v25 }
 0x2ab   :  { %v341_v29 = vpop.f32.mrf.mxu1 }
 0x2ac   :  { %v342_v30 = vadd.f32 %v406_v27, %v341_v29 }
 0x2ad   :  { %v434_v31 = vpop.f32.mrf.mxu1 }
 0x2ae   :  { %v351_v32 = vadd.f32 %v371_v28, %v342_v30 }
 0x2b0   :  { %353 = vst.msk [vmem:[#allocation2] sm:$0xff] %vm352_vm4, %v351_v32 }
 0x2b1   :  { %461 = shalt.err (!%p458_p4)
}
 0x2b2   :  { %363 = dma.vmem_to_hbm [thread:$0]  %s361_s15, 128, %s742_s5, [#allocation3]  }
 0x2b3   :  { %470 = dma.done.wait [#allocation3], 128  }
 0x2b4   :  { %471 = vsyncadd [#allocation3], 4294967168 }
 0x2b5   :  { %367 = vsyncpa [#allocation3], 1 }

</bundles_post_ra>
